<compile_context>
chip_gen: v5e
topology: v5e:2x2
jax: 0.10.0
libtpu: 0.0.40
codegen_flags: <defaults>
</compile_context>

<pallas_src>
import jax
import jax.numpy as jnp
from jax.experimental import pallas as pl
from jax.experimental.pallas import tpu as pltpu


def _make_mlp_kernel(compute_dtype):
    def kernel(x_ref,
               w1_ref, b1_ref,
               w2_ref, b2_ref,
               w3_ref, b3_ref,
               w4_ref, b4_ref,
               o_ref):
        # Layer 1: (tb, Wp) @ (Wp, 512) + (1, 512), ReLU   (f32 accumulate)
        h = jnp.dot(x_ref[...], w1_ref[...], preferred_element_type=jnp.float32)
        h = jnp.maximum(h + b1_ref[...], 0.0)
        # Layer 2: (tb, 512) @ (512, 256) + (1, 256), ReLU
        h = jnp.dot(h.astype(compute_dtype), w2_ref[...],
                    preferred_element_type=jnp.float32)
        h = jnp.maximum(h + b2_ref[...], 0.0)
        # Layer 3: (tb, 256) @ (256, 128) + (1, 128), ReLU
        h = jnp.dot(h.astype(compute_dtype), w3_ref[...],
                    preferred_element_type=jnp.float32)
        h = jnp.maximum(h + b3_ref[...], 0.0)
        # Layer 4: (tb, 128) @ (128, Tp) + (1, Tp)   (no activation)
        out = jnp.dot(h.astype(compute_dtype), w4_ref[...],
                      preferred_element_type=jnp.float32)
        o_ref[...] = (out + b4_ref[...]).astype(o_ref.dtype)

    return kernel


def _round_up(n, m):
    return pl.cdiv(n, m) * m


def dnn_forward(x, params, *, tile_b=256, compute_dtype=jnp.bfloat16):
    """x: (B, windows_size, 1) float32. Returns (B, target_size) float32."""
    # Glue: squeeze(-1) as in the PyTorch forward.
    x2d = jnp.squeeze(x, axis=-1)
    B, W = x2d.shape
    (w1, b1), (w2, b2), (w3, b3), (w4, b4) = params
    H1, H2, H3, T = w1.shape[1], w2.shape[1], w3.shape[1], w4.shape[1]

    # Lane-dense padding for the ragged dims (layer-1 K and the output dim).
    W_pad = _round_up(max(W, 128), 128)
    T_pad = _round_up(max(T, 128), 128)

    # Batch tiling; ragged tail handled by zero padding (padded rows are junk
    # but harmless and sliced off afterwards).
    tb = min(tile_b, _round_up(B, 8))
    B_pad = _round_up(B, tb)
    grid = (B_pad // tb,)

    # Cast / pad operands once in the wrapper (MXU operands in compute_dtype,
    # biases kept f32 for the accumulate/ReLU path).
    x_p = jnp.zeros((B_pad, W_pad), compute_dtype).at[:B, :W].set(
        x2d.astype(compute_dtype))
    w1_p = jnp.zeros((W_pad, H1), compute_dtype).at[:W, :].set(
        w1.astype(compute_dtype))
    w2_c = w2.astype(compute_dtype)
    w3_c = w3.astype(compute_dtype)
    w4_p = jnp.zeros((H3, T_pad), compute_dtype).at[:, :T].set(
        w4.astype(compute_dtype))
    b1_c = b1.astype(jnp.float32)
    b2_c = b2.astype(jnp.float32)
    b3_c = b3.astype(jnp.float32)
    b4_p = jnp.zeros((1, T_pad), jnp.float32).at[:, :T].set(
        b4.astype(jnp.float32))

    def resident(arr):
        # Full-array block with a constant index_map: DMA'd once, VMEM-resident.
        shape = arr.shape
        return pl.BlockSpec(shape, lambda i: (0,) * len(shape))

    flops = 2 * B_pad * (W_pad * H1 + H1 * H2 + H2 * H3 + H3 * T_pad)
    bytes_accessed = (
        x_p.size * x_p.dtype.itemsize
        + sum(int(a.size) * a.dtype.itemsize
              for a in (w1_p, b1_c, w2_c, b2_c, w3_c, b3_c, w4_p, b4_p))
        + B_pad * T_pad * 4)

    out_p = pl.pallas_call(
        _make_mlp_kernel(compute_dtype),
        out_shape=jax.ShapeDtypeStruct((B_pad, T_pad), jnp.float32),
        grid_spec=pltpu.PrefetchScalarGridSpec(
            num_scalar_prefetch=0,
            grid=grid,
            in_specs=[
                pl.BlockSpec((tb, W_pad), lambda i: (i, 0)),  # x tile
                resident(w1_p), resident(b1_c),
                resident(w2_c), resident(b2_c),
                resident(w3_c), resident(b3_c),
                resident(w4_p), resident(b4_p),
            ],
            out_specs=pl.BlockSpec((tb, T_pad), lambda i: (i, 0)),
        ),
        compiler_params=pltpu.CompilerParams(
            dimension_semantics=("parallel",)),
        cost_estimate=pl.CostEstimate(
            flops=int(flops), transcendentals=0,
            bytes_accessed=int(bytes_accessed)),
    )(x_p, w1_p, b1_c, w2_c, b2_c, w3_c, b3_c, w4_p, b4_p)

    return out_p[:B, :T]


def init_params(key, windows_size, target_size):
    """Deterministic init mimicking nn.Linear's U(-1/sqrt(fan_in), 1/sqrt(fan_in))."""
    dims = [windows_size, 512, 256, 128, target_size]
    params = []
    for i in range(4):
        fan_in, fan_out = dims[i], dims[i + 1]
        key, kw, kb = jax.random.split(key, 3)
        bound = 1.0 / jnp.sqrt(fan_in)
        w = jax.random.uniform(kw, (fan_in, fan_out), jnp.float32, -bound, bound)
        b = jax.random.uniform(kb, (1, fan_out), jnp.float32, -bound, bound)
        params.append((w, b))
    return params


def dnn_reference_mixed(x, params, compute_dtype=jnp.bfloat16):
    """Plain-JAX reference mirroring the kernel's numeric path (bf16 MXU, f32 acc)."""
    h = jnp.squeeze(x, axis=-1).astype(jnp.float32)
    n = len(params)
    for i, (w, b) in enumerate(params):
        z = jnp.dot(h.astype(compute_dtype), w.astype(compute_dtype),
                    preferred_element_type=jnp.float32) + b
        h = z if i == n - 1 else jnp.maximum(z, 0.0)
    return h


def dnn_reference_f32(x, params):
    """Pure float32 reference (PyTorch semantics)."""
    h = jnp.squeeze(x, axis=-1)
    (w1, b1), (w2, b2), (w3, b3), (w4, b4) = params
    h = jnp.maximum(h @ w1 + b1, 0.0)
    h = jnp.maximum(h @ w2 + b2, 0.0)
    h = jnp.maximum(h @ w3 + b3, 0.0)
    return h @ w4 + b4


if __name__ == "__main__":
    windows_size = 8
    target_size = 4

    key = jax.random.PRNGKey(0)
    key, kx1, kx2 = jax.random.split(key, 3)
    params = init_params(key, windows_size, target_size)

    # Case 1: small batch, default (large) tile -> single grid step.
    x1 = jax.random.normal(kx1, (16, windows_size, 1), jnp.float32)
    out1 = jax.block_until_ready(dnn_forward(x1, params))
    assert out1.shape == (16, target_size)
    ref1_mixed = dnn_reference_mixed(x1, params)
    ref1_f32 = dnn_reference_f32(x1, params)
    assert jnp.allclose(out1, ref1_mixed, atol=5e-3, rtol=5e-3), "mismatch vs bf16-path reference"
    assert jnp.allclose(out1, ref1_f32, atol=5e-2, rtol=5e-2), "mismatch vs f32 reference"

    # Case 2: ragged batch (20) with small explicit tile (8) -> cdiv grid + padded tail.
    x2 = jax.random.normal(kx2, (20, windows_size, 1), jnp.float32)
    out2 = jax.block_until_ready(dnn_forward(x2, params, tile_b=8))
    assert out2.shape == (20, target_size)
    ref2_mixed = dnn_reference_mixed(x2, params)
    ref2_f32 = dnn_reference_f32(x2, params)
    assert jnp.allclose(out2, ref2_mixed, atol=5e-3, rtol=5e-3), "mismatch vs bf16-path reference"
    assert jnp.allclose(out2, ref2_f32, atol=5e-2, rtol=5e-2), "mismatch vs f32 reference"

    print("KERNEL_OK")
</pallas_src>

<mosaic_0001>
module attributes {stable_mosaic.version = 11 : i64} {
  func.func @kernel(%arg0: i32, %arg1: memref<16x128xbf16, #tpu.memory_space<vmem>>, %arg2: memref<128x512xbf16, #tpu.memory_space<vmem>>, %arg3: memref<1x512xf32, #tpu.memory_space<vmem>>, %arg4: memref<512x256xbf16, #tpu.memory_space<vmem>>, %arg5: memref<1x256xf32, #tpu.memory_space<vmem>>, %arg6: memref<256x128xbf16, #tpu.memory_space<vmem>>, %arg7: memref<1x128xf32, #tpu.memory_space<vmem>>, %arg8: memref<128x128xbf16, #tpu.memory_space<vmem>>, %arg9: memref<1x128xf32, #tpu.memory_space<vmem>>, %arg10: memref<16x128xf32, #tpu.memory_space<vmem>>) attributes {dimension_semantics = [#tpu.dimension_semantics<parallel>], iteration_bounds = array<i64: 1>, scalar_prefetch = 0 : i64, scratch_operands = 0 : i64, tpu.core_type = #tpu.core_type<tc>, window_params = [{transform_indices = @transform_0, window_bounds = array<i64: 16, 128>}, {pipeline_mode = #tpu.pipeline_mode<synchronous>, transform_indices = @transform_1, window_bounds = array<i64: 128, 512>}, {pipeline_mode = #tpu.pipeline_mode<synchronous>, transform_indices = @transform_2, window_bounds = array<i64: 1, 512>}, {pipeline_mode = #tpu.pipeline_mode<synchronous>, transform_indices = @transform_3, window_bounds = array<i64: 512, 256>}, {pipeline_mode = #tpu.pipeline_mode<synchronous>, transform_indices = @transform_4, window_bounds = array<i64: 1, 256>}, {pipeline_mode = #tpu.pipeline_mode<synchronous>, transform_indices = @transform_5, window_bounds = array<i64: 256, 128>}, {pipeline_mode = #tpu.pipeline_mode<synchronous>, transform_indices = @transform_6, window_bounds = array<i64: 1, 128>}, {pipeline_mode = #tpu.pipeline_mode<synchronous>, transform_indices = @transform_7, window_bounds = array<i64: 128, 128>}, {pipeline_mode = #tpu.pipeline_mode<synchronous>, transform_indices = @transform_8, window_bounds = array<i64: 1, 128>}, {transform_indices = @transform_9, window_bounds = array<i64: 16, 128>}]} {
    %c0 = arith.constant 0 : index
    %c0_0 = arith.constant 0 : index
    %0 = vector.load %arg1[%c0, %c0_0] : memref<16x128xbf16, #tpu.memory_space<vmem>>, vector<16x128xbf16>
    %c0_1 = arith.constant 0 : index
    %c0_2 = arith.constant 0 : index
    %1 = vector.load %arg2[%c0_1, %c0_2] : memref<128x512xbf16, #tpu.memory_space<vmem>>, vector<128x512xbf16>
    %cst = arith.constant dense<0.000000e+00> : vector<16x512xf32>
    %2 = tpu.matmul %0, %1, %cst {dimension_numbers = #tpu.dot_dimension_numbers<[1], [0], [0], [1], [0, 0, 1, 1], [], []>} : vector<16x128xbf16>, vector<128x512xbf16>, vector<16x512xf32> -> vector<16x512xf32>
    %c0_3 = arith.constant 0 : index
    %c0_4 = arith.constant 0 : index
    %3 = vector.load %arg3[%c0_3, %c0_4] : memref<1x512xf32, #tpu.memory_space<vmem>>, vector<1x512xf32>
    %4 = vector.broadcast %3 : vector<1x512xf32> to vector<16x512xf32>
    %5 = arith.addf %2, %4 : vector<16x512xf32>
    %cst_5 = arith.constant 0.000000e+00 : f32
    %6 = vector.broadcast %cst_5 : f32 to vector<16x512xf32>
    %7 = arith.maximumf %5, %6 : vector<16x512xf32>
    %8 = arith.truncf %7 : vector<16x512xf32> to vector<16x512xbf16>
    %c0_6 = arith.constant 0 : index
    %c0_7 = arith.constant 0 : index
    %9 = vector.load %arg4[%c0_6, %c0_7] : memref<512x256xbf16, #tpu.memory_space<vmem>>, vector<512x256xbf16>
    %cst_8 = arith.constant dense<0.000000e+00> : vector<16x256xf32>
    %10 = tpu.matmul %8, %9, %cst_8 {dimension_numbers = #tpu.dot_dimension_numbers<[1], [0], [0], [1], [0, 0, 1, 1], [], []>} : vector<16x512xbf16>, vector<512x256xbf16>, vector<16x256xf32> -> vector<16x256xf32>
    %c0_9 = arith.constant 0 : index
    %c0_10 = arith.constant 0 : index
    %11 = vector.load %arg5[%c0_9, %c0_10] : memref<1x256xf32, #tpu.memory_space<vmem>>, vector<1x256xf32>
    %12 = vector.broadcast %11 : vector<1x256xf32> to vector<16x256xf32>
    %13 = arith.addf %10, %12 : vector<16x256xf32>
    %cst_11 = arith.constant 0.000000e+00 : f32
    %14 = vector.broadcast %cst_11 : f32 to vector<16x256xf32>
    %15 = arith.maximumf %13, %14 : vector<16x256xf32>
    %16 = arith.truncf %15 : vector<16x256xf32> to vector<16x256xbf16>
    %c0_12 = arith.constant 0 : index
    %c0_13 = arith.constant 0 : index
    %17 = vector.load %arg6[%c0_12, %c0_13] : memref<256x128xbf16, #tpu.memory_space<vmem>>, vector<256x128xbf16>
    %cst_14 = arith.constant dense<0.000000e+00> : vector<16x128xf32>
    %18 = tpu.matmul %16, %17, %cst_14 {dimension_numbers = #tpu.dot_dimension_numbers<[1], [0], [0], [1], [0, 0, 1, 1], [], []>} : vector<16x256xbf16>, vector<256x128xbf16>, vector<16x128xf32> -> vector<16x128xf32>
    %c0_15 = arith.constant 0 : index
    %c0_16 = arith.constant 0 : index
    %19 = vector.load %arg7[%c0_15, %c0_16] : memref<1x128xf32, #tpu.memory_space<vmem>>, vector<1x128xf32>
    %20 = vector.broadcast %19 : vector<1x128xf32> to vector<16x128xf32>
    %21 = arith.addf %18, %20 : vector<16x128xf32>
    %cst_17 = arith.constant 0.000000e+00 : f32
    %22 = vector.broadcast %cst_17 : f32 to vector<16x128xf32>
    %23 = arith.maximumf %21, %22 : vector<16x128xf32>
    %24 = arith.truncf %23 : vector<16x128xf32> to vector<16x128xbf16>
    %c0_18 = arith.constant 0 : index
    %c0_19 = arith.constant 0 : index
    %25 = vector.load %arg8[%c0_18, %c0_19] : memref<128x128xbf16, #tpu.memory_space<vmem>>, vector<128x128xbf16>
    %cst_20 = arith.constant dense<0.000000e+00> : vector<16x128xf32>
    %26 = tpu.matmul %24, %25, %cst_20 {dimension_numbers = #tpu.dot_dimension_numbers<[1], [0], [0], [1], [0, 0, 1, 1], [], []>} : vector<16x128xbf16>, vector<128x128xbf16>, vector<16x128xf32> -> vector<16x128xf32>
    %c0_21 = arith.constant 0 : index
    %c0_22 = arith.constant 0 : index
    %27 = vector.load %arg9[%c0_21, %c0_22] : memref<1x128xf32, #tpu.memory_space<vmem>>, vector<1x128xf32>
    %28 = vector.broadcast %27 : vector<1x128xf32> to vector<16x128xf32>
    %29 = arith.addf %26, %28 : vector<16x128xf32>
    %c0_23 = arith.constant 0 : index
    %c0_24 = arith.constant 0 : index
    %30 = vector.load %arg10[%c0_23, %c0_24] : memref<16x128xf32, #tpu.memory_space<vmem>>, vector<16x128xf32>
    tpu.vector_store %arg10[%c0_23, %c0_24], %29 {strides = array<i32>} : memref<16x128xf32, #tpu.memory_space<vmem>>, vector<16x128xf32>,
    return
  }
  func.func @transform_0(%arg0: i32) -> (i32, i32) {
    %c0_i32 = arith.constant 0 : i32
    %c0_i32_0 = arith.constant 0 : i32
    return %arg0, %c0_i32 : i32, i32
  }
  func.func @transform_1(%arg0: i32) -> (i32, i32) {
    %c0_i32 = arith.constant 0 : i32
    %c0_i32_0 = arith.constant 0 : i32
    %c0_i32_1 = arith.constant 0 : i32
    return %c0_i32, %c0_i32_0 : i32, i32
  }
  func.func @transform_2(%arg0: i32) -> (i32, i32) {
    %c0_i32 = arith.constant 0 : i32
    %c0_i32_0 = arith.constant 0 : i32
    %c0_i32_1 = arith.constant 0 : i32
    return %c0_i32, %c0_i32_0 : i32, i32
  }
  func.func @transform_3(%arg0: i32) -> (i32, i32) {
    %c0_i32 = arith.constant 0 : i32
    %c0_i32_0 = arith.constant 0 : i32
    %c0_i32_1 = arith.constant 0 : i32
    return %c0_i32, %c0_i32_0 : i32, i32
  }
  func.func @transform_4(%arg0: i32) -> (i32, i32) {
    %c0_i32 = arith.constant 0 : i32
    %c0_i32_0 = arith.constant 0 : i32
    %c0_i32_1 = arith.constant 0 : i32
    return %c0_i32, %c0_i32_0 : i32, i32
  }
  func.func @transform_5(%arg0: i32) -> (i32, i32) {
    %c0_i32 = arith.constant 0 : i32
    %c0_i32_0 = arith.constant 0 : i32
    %c0_i32_1 = arith.constant 0 : i32
    return %c0_i32, %c0_i32_0 : i32, i32
  }
  func.func @transform_6(%arg0: i32) -> (i32, i32) {
    %c0_i32 = arith.constant 0 : i32
    %c0_i32_0 = arith.constant 0 : i32
    %c0_i32_1 = arith.constant 0 : i32
    return %c0_i32, %c0_i32_0 : i32, i32
  }
  func.func @transform_7(%arg0: i32) -> (i32, i32) {
    %c0_i32 = arith.constant 0 : i32
    %c0_i32_0 = arith.constant 0 : i32
    %c0_i32_1 = arith.constant 0 : i32
    return %c0_i32, %c0_i32_0 : i32, i32
  }
  func.func @transform_8(%arg0: i32) -> (i32, i32) {
    %c0_i32 = arith.constant 0 : i32
    %c0_i32_0 = arith.constant 0 : i32
    %c0_i32_1 = arith.constant 0 : i32
    return %c0_i32, %c0_i32_0 : i32, i32
  }
  func.func @transform_9(%arg0: i32) -> (i32, i32) {
    %c0_i32 = arith.constant 0 : i32
    %c0_i32_0 = arith.constant 0 : i32
    return %arg0, %c0_i32 : i32, i32
  }
}

</mosaic_0001>

<bundles_post_ra>
// kernel: tpu_custom_call.1
= control target key start
LH: loop header
LB: loop body
LE: loop exit
PB: predicated region body
PF: predicated region fallthrough
CT: control target
= control target key end

     0   :  { %14 = vsyncpa [#allocation3], 0  ;;  %s2077_s0 = inlined_call_operand.hbm [shape: bf16[16,128], index: 0, kind: input, shape index: {}]   ;;  %s2078_s1 = inlined_call_operand.hbm [shape: bf16[128,512], index: 1, kind: input, shape index: {}]   ;;  %s2079_s2 = inlined_call_operand.hbm [shape: f32[1,512], index: 2, kind: input, shape index: {}]   ;;  %s2080_s3 = inlined_call_operand.hbm [shape: bf16[512,256], index: 3, kind: input, shape index: {}]   ;;  %s2081_s4 = inlined_call_operand.vmem [shape: f32[1,256], index: 4, kind: input, shape index: {}]   ;;  %s2082_s5 = inlined_call_operand.hbm [shape: bf16[256,128], index: 5, kind: input, shape index: {}]   ;;  %s2083_s6 = inlined_call_operand.vmem [shape: f32[1,128], index: 6, kind: input, shape index: {}]   ;;  %s2084_s7 = inlined_call_operand.hbm [shape: bf16[128,128], index: 7, kind: input, shape index: {}]   ;;  %s2085_s8 = inlined_call_operand.vmem [shape: f32[1,128], index: 8, kind: input, shape index: {}]   ;;  %s2086_s9 = inlined_call_operand.hbm [shape: f32[16,128], index: 9, kind: output, shape index: {}]  }
   0x1   :  { %15 = vsyncpa [#allocation6], 0 }
   0x2   :  { %16 = vsyncpa [#allocation9], 0 }
   0x3   :  { %17 = vsyncpa [#allocation12], 0  ;;  %s36_s11 = sshll.u32 %s2078_s1, 4  ;;  %s37_s11 = int_to_ptr.hbm [resolvable:$true] %s36_s11 }
   0x4   :  { %18 = vsyncpa [#allocation4], 0  ;;  %s1978_s12 = smov [#allocation5]   ;;  %s60_s16 = sshll.u32 %s2080_s3, 4  ;;  %s61_s16 = int_to_ptr.hbm [resolvable:$true] %s60_s16 }
   0x5   :  { %s38_s13 = sshll.u32 %s1978_s12, 4  ;;  %s1979_s17 = smov 256   ;;  %s39_s13 = int_to_ptr.vmem [resolvable:$true] %s38_s13 }
   0x6   :  { %s1980_s18 = smov 16   ;;  %s1981_s19 = smov [#allocation8]  }
   0x7   :  { %44 = dma.hbm_to_vmem [thread:$0]  %s37_s11, 4096, %s39_s13, [#allocation6], %s1979_s17, %s1979_s17, %s1980_s18  }
   0x8   :  { %s62_s20 = sshll.u32 %s1981_s19, 4  ;;  %s1982_s21 = smov 128   ;;  %s63_s20 = int_to_ptr.vmem [resolvable:$true] %s62_s20 }
   0x9   :  { %s1983_s22 = smov 8   ;;  %s23_s24 = sshll.u32 %s2077_s0, 4  ;;  %s24_s24 = int_to_ptr.hbm [resolvable:$true] %s23_s24 }
   0xa   :  { %68 = dma.hbm_to_vmem [thread:$0]  %s61_s16, 8192, %s63_s20, [#allocation9], %s1982_s21, %s1982_s21, %s1983_s22  }
   0xb   :  { %s1984_s25 = smov [#allocation2]   ;;  %s50_s28 = sshll.u32 %s2079_s2, 4  ;;  %s51_s28 = int_to_ptr.hbm [resolvable:$true] %s50_s28 }
   0xc   :  { %s25_s3 = sshll.u32 %s1984_s25, 4  ;;  %s1985_s29 = smov 64   ;;  %s26_s3 = int_to_ptr.vmem [resolvable:$true] %s25_s3 }
   0xd   :  { %s1986_s30 = smov 4   ;;  %s1987_s10 = smov [#allocation7]  }
   0xe   :  { %31 = dma.hbm_to_vmem [thread:$0]  %s24_s24, 128, %s26_s3, [#allocation3], %s1985_s29, %s1985_s29, %s1986_s30  }
   0xf   :  { %s52_s11 = sshll.u32 %s1987_s10, 4  ;;  %s75_s14 = sshll.u32 %s2082_s5, 4  ;;  %s53_s11 = int_to_ptr.vmem [resolvable:$true] %s52_s11  ;;  %s76_s14 = int_to_ptr.hbm [resolvable:$true] %s75_s14 }
  0x10   :  { %55 = dma.hbm_to_vmem [thread:$0]  %s51_s28, 64, %s53_s11, [#allocation6]  }
  0x11   :  { %s90_s16 = sshll.u32 %s2084_s7, 4  ;;  %s1988_s17 = smov [#allocation10]   ;;  %s91_s16 = int_to_ptr.hbm [resolvable:$true] %s90_s16 }
  0x12   :  { %s77_s18 = sshll.u32 %s1988_s17, 4  ;;  %s1989_s2 = smov [#allocation11]   ;;  %s78_s18 = int_to_ptr.vmem [resolvable:$true] %s77_s18 }
  0x13   :  { %83 = dma.hbm_to_vmem [thread:$0]  %s76_s14, 2048, %s78_s18, [#allocation9], %s1985_s29, %s1985_s29, %s1986_s30  }
  0x14   :  { %s92_s19 = sshll.u32 %s1989_s2, 4  ;;  %s93_s19 = int_to_ptr.vmem [resolvable:$true] %s92_s19 }
  0x15   :  { %98 = dma.hbm_to_vmem [thread:$0]  %s91_s16, 1024, %s93_s19, [#allocation12], %s1985_s29, %s1985_s29, %s1986_s30  }
  0x16   :  { %1968 = dma.done.wait [#allocation3], 128  }
  0x17   :  { %1969 = vsyncadd [#allocation3], 4294967168 }
  0x18   :  { %1970 = dma.done.wait [#allocation6], 4160  }
  0x19   :  { %1971 = vsyncadd [#allocation6], 4294963136 }
  0x1a   :  { %1972 = dma.done.wait [#allocation9], 10240  }
  0x1b   :  { %1973 = vsyncadd [#allocation9], 4294957056 }
  0x1c   :  { %1974 = dma.done.wait [#allocation12], 1024  }
  0x1d   :  { %1975 = vsyncadd [#allocation12], 4294966272  ;;  %v1298_v0 = vld [vmem:[#allocation5 + $0xe0] sm:$0xf]  ;;  %v1695_v1 = vld [vmem:[#allocation5 + $0xec] sm:$0xf0] }
  0x1e   :  { %v1693_v2 = vld [vmem:[#allocation5 + $0xe4] sm:$0xf]  ;;  %v1299_v3 = vor.u32 %v1695_v1, %v1298_v0  ;;  %v1300_v4 = vld [vmem:[#allocation5 + $0xf0] sm:$0xf0]  ;;  %v1306_v5 = vld [vmem:[#allocation5 + $0xe8] sm:$0xf] }
  0x1f   :  { %v1696_v6 = vld [vmem:[#allocation5 + $0xf4] sm:$0xf0]  ;;  %v1303_v7 = vor.u32 %v1693_v2, %v1300_v4  ;;  %v1694_v9 = vld [vmem:[#allocation5 + $0xec] sm:$0xf]  ;;  %v1308_v10 = vld [vmem:[#allocation5 + $0xf8] sm:$0xf0] }
  0x20   :  { %v1307_v8 = vor.u32 %v1696_v6, %v1306_v5  ;;  %v1282_v11 = vld [vmem:[#allocation5 + $0xc0] sm:$0xf]  ;;  %335 = vmatpush.bf16.msra.mxu0 %v1299_v3  ;;  %v1311_v12 = vor.u32 %v1694_v9, %v1308_v10  ;;  %v1691_v13 = vld [vmem:[#allocation5 + $0xcc] sm:$0xf0]  ;;  %v1689_v14 = vld [vmem:[#allocation5 + $0xc4] sm:$0xf] }
  0x21   :  { %v1284_v15 = vld [vmem:[#allocation5 + $0xd0] sm:$0xf0]  ;;  %349 = vmatpush.bf16.msra.mxu1 %v1303_v7  ;;  %v1283_v16 = vor.u32 %v1691_v13, %v1282_v11  ;;  %v1290_v18 = vld [vmem:[#allocation5 + $0xc8] sm:$0xf]  ;;  %v1692_v19 = vld [vmem:[#allocation5 + $0xd4] sm:$0xf0] }
  0x22   :  { %363 = vmatpush.bf16.msra.mxu2 %v1307_v8  ;;  %v1287_v17 = vor.u32 %v1689_v14, %v1284_v15  ;;  %v1690_v20 = vld [vmem:[#allocation5 + $0xcc] sm:$0xf]  ;;  %377 = vmatpush.bf16.msra.mxu3 %v1311_v12  ;;  %v1291_v21 = vor.u32 %v1692_v19, %v1290_v18  ;;  %v1292_v22 = vld [vmem:[#allocation5 + $0xd8] sm:$0xf0]  ;;  %v1266_v23 = vld [vmem:[#allocation5 + $0xa0] sm:$0xf] }
  0x23   :  { %v1687_v24 = vld [vmem:[#allocation5 + $0xac] sm:$0xf0]  ;;  %v1295_v25 = vor.u32 %v1690_v20, %v1292_v22  ;;  %v1685_v26 = vld [vmem:[#allocation5 + $0xa4] sm:$0xf]  ;;  %v1268_v27 = vld [vmem:[#allocation5 + $0xb0] sm:$0xf0] }
  0x24   :  { %v1274_v28 = vld [vmem:[#allocation5 + $0xa8] sm:$0xf]  ;;  %336 = vmatpush.bf16.msra.mxu0 %v1283_v16  ;;  %v1267_v29 = vor.u32 %v1687_v24, %v1266_v23  ;;  %v1688_v30 = vld [vmem:[#allocation5 + $0xb4] sm:$0xf0]  ;;  %v1686_v31 = vld [vmem:[#allocation5 + $0xac] sm:$0xf]  ;;  %v1271_v33 = vor.u32 %v1685_v26, %v1268_v27 }
  0x25   :  { %v1276_v32 = vld [vmem:[#allocation5 + $0xb8] sm:$0xf0]  ;;  %350 = vmatpush.bf16.msra.mxu1 %v1287_v17  ;;  %v1275_v34 = vor.u32 %v1688_v30, %v1274_v28  ;;  %v1250_v35 = vld [vmem:[#allocation5 + $0x80] sm:$0xf]  ;;  %v1683_v36 = vld [vmem:[#allocation5 + $0x8c] sm:$0xf0] }
  0x26   :  { %364 = vmatpush.bf16.msra.mxu2 %v1291_v21  ;;  %v1681_v37 = vld [vmem:[#allocation5 + $0x84] sm:$0xf]  ;;  %378 = vmatpush.bf16.msra.mxu3 %v1295_v25  ;;  %v1279_v38 = vor.u32 %v1686_v31, %v1276_v32  ;;  %v1252_v39 = vld [vmem:[#allocation5 + $0x90] sm:$0xf0]  ;;  %v1258_v40 = vld [vmem:[#allocation5 + $0x88] sm:$0xf]  ;;  %v1251_v44 = vor.u32 %v1683_v36, %v1250_v35 }
  0x27   :  { %v1684_v41 = vld [vmem:[#allocation5 + $0x94] sm:$0xf0]  ;;  %v1682_v42 = vld [vmem:[#allocation5 + $0x8c] sm:$0xf]  ;;  %v1260_v43 = vld [vmem:[#allocation5 + $0x98] sm:$0xf0]  ;;  %v1255_v45 = vor.u32 %v1681_v37, %v1252_v39 }
  0x28   :  { %337 = vmatpush.bf16.msra.mxu0 %v1267_v29  ;;  %v1259_v46 = vor.u32 %v1684_v41, %v1258_v40  ;;  %v1234_v47 = vld [vmem:[#allocation5 + $0x60] sm:$0xf]  ;;  %v1679_v48 = vld [vmem:[#allocation5 + $0x6c] sm:$0xf0]  ;;  %v1677_v49 = vld [vmem:[#allocation5 + $0x64] sm:$0xf]  ;;  %v1263_v50 = vor.u32 %v1682_v42, %v1260_v43 }
  0x29   :  { %351 = vmatpush.bf16.msra.mxu1 %v1271_v33  ;;  %v1236_v51 = vld [vmem:[#allocation5 + $0x70] sm:$0xf0]  ;;  %v1242_v52 = vld [vmem:[#allocation5 + $0x68] sm:$0xf]  ;;  %v1680_v53 = vld [vmem:[#allocation5 + $0x74] sm:$0xf0]  ;;  %v1235_v56 = vor.u32 %v1679_v48, %v1234_v47 }
  0x2a   :  { %365 = vmatpush.bf16.msra.mxu2 %v1275_v34  ;;  %379 = vmatpush.bf16.msra.mxu3 %v1279_v38  ;;  %v1678_v54 = vld [vmem:[#allocation5 + $0x6c] sm:$0xf]  ;;  %v1244_v55 = vld [vmem:[#allocation5 + $0x78] sm:$0xf0]  ;;  %v1239_v57 = vor.u32 %v1677_v49, %v1236_v51  ;;  %v1243_v58 = vor.u32 %v1680_v53, %v1242_v52  ;;  %v1218_v59 = vld [vmem:[#allocation5 + $0x40] sm:$0xf] }
  0x2b   :  { %v1675_v60 = vld [vmem:[#allocation5 + $0x4c] sm:$0xf0]  ;;  %v1673_v61 = vld [vmem:[#allocation5 + $0x44] sm:$0xf]  ;;  %v1247_v62 = vor.u32 %v1678_v54, %v1244_v55  ;;  %v1220_v63 = vld [vmem:[#allocation5 + $0x50] sm:$0xf0] }
  0x2c   :  { %338 = vmatpush.bf16.msra.mxu0 %v1251_v44  ;;  %v1226_v0 = vld [vmem:[#allocation5 + $0x48] sm:$0xf]  ;;  %v1676_v1 = vld [vmem:[#allocation5 + $0x54] sm:$0xf0]  ;;  %v1674_v2 = vld [vmem:[#allocation5 + $0x4c] sm:$0xf]  ;;  %v1219_v4 = vor.u32 %v1675_v60, %v1218_v59  ;;  %v1223_v5 = vor.u32 %v1673_v61, %v1220_v63 }
  0x2d   :  { %352 = vmatpush.bf16.msra.mxu1 %v1255_v45  ;;  %v1228_v3 = vld [vmem:[#allocation5 + $0x58] sm:$0xf0]  ;;  %v1227_v6 = vor.u32 %v1676_v1, %v1226_v0  ;;  %v1202_v7 = vld [vmem:[#allocation5 + $0x20] sm:$0xf]  ;;  %v1671_v8 = vld [vmem:[#allocation5 + $0x2c] sm:$0xf0] }
  0x2e   :  { %366 = vmatpush.bf16.msra.mxu2 %v1259_v46  ;;  %380 = vmatpush.bf16.msra.mxu3 %v1263_v50  ;;  %v1669_v9 = vld [vmem:[#allocation5 + $0x24] sm:$0xf]  ;;  %v1231_v10 = vor.u32 %v1674_v2, %v1228_v3  ;;  %v1204_v11 = vld [vmem:[#allocation5 + $0x30] sm:$0xf0]  ;;  %v1210_v12 = vld [vmem:[#allocation5 + $0x28] sm:$0xf]  ;;  %v1203_v16 = vor.u32 %v1671_v8, %v1202_v7 }
  0x2f   :  { %v1672_v13 = vld [vmem:[#allocation5 + $0x34] sm:$0xf0]  ;;  %v1670_v14 = vld [vmem:[#allocation5 + $0x2c] sm:$0xf]  ;;  %v1212_v15 = vld [vmem:[#allocation5 + $0x38] sm:$0xf0]  ;;  %v1207_v18 = vor.u32 %v1669_v9, %v1204_v11 }
  0x30   :  { %339 = vmatpush.bf16.msra.mxu0 %v1235_v56  ;;  %v1186_v17 = vld [vmem:[#allocation5] sm:$0xf]  ;;  %v1211_v19 = vor.u32 %v1672_v13, %v1210_v12  ;;  %v1667_v20 = vld [vmem:[#allocation5 + $0xc] sm:$0xf0]  ;;  %v1665_v21 = vld [vmem:[#allocation5 + $0x4] sm:$0xf]  ;;  %v1215_v23 = vor.u32 %v1670_v14, %v1212_v15 }
  0x31   :  { %353 = vmatpush.bf16.msra.mxu1 %v1239_v57  ;;  %v1188_v22 = vld [vmem:[#allocation5 + $0x10] sm:$0xf0]  ;;  %v1194_v24 = vld [vmem:[#allocation5 + $0x8] sm:$0xf]  ;;  %v1668_v25 = vld [vmem:[#allocation5 + $0x14] sm:$0xf0]  ;;  %v1187_v30 = vor.u32 %v1667_v20, %v1186_v17 }
  0x32   :  { %367 = vmatpush.bf16.msra.mxu2 %v1243_v58  ;;  %381 = vmatpush.bf16.msra.mxu3 %v1247_v62  ;;  %v1666_v26 = vld [vmem:[#allocation5 + $0xc] sm:$0xf]  ;;  %v1196_v27 = vld [vmem:[#allocation5 + $0x18] sm:$0xf0]  ;;  %v1370_v28 = vld [vmem:[#allocation8 + $0x70] sm:$0xf]  ;;  %v1191_v33 = vor.u32 %v1665_v21, %v1188_v22  ;;  %v1195_v34 = vor.u32 %v1668_v25, %v1194_v24 }
  0x33   :  { %v1712_v29 = vld [vmem:[#allocation8 + $0x74] sm:$0xf0]  ;;  %v1434_v31 = vld [vmem:[#allocation8 + $0xf0] sm:$0xf]  ;;  %v1199_v36 = vor.u32 %v1666_v26, %v1196_v27  ;;  %v1362_v38 = vld [vmem:[#allocation8 + $0x60] sm:$0xf] }
  0x34   :  { %340 = vmatpush.bf16.msra.mxu0 %v1219_v4  ;;  %v1728_v32 = vld [vmem:[#allocation8 + $0xf4] sm:$0xf0]  ;;  %v1371_v37 = vor.u32 %v1712_v29, %v1370_v28  ;;  %v1498_v39 = vld [vmem:[#allocation8 + $0x170] sm:$0xf]  ;;  %v1710_v42 = vld [vmem:[#allocation8 + $0x64] sm:$0xf0] }
  0x35   :  { %354 = vmatpush.bf16.msra.mxu1 %v1223_v5  ;;  %v1664_v35 = vld [vmem:[#allocation2] sm:$0xff]  ;;  %v1435_v41 = vor.u32 %v1728_v32, %v1434_v31  ;;  %v1562_v43 = vld [vmem:[#allocation8 + $0x1f0] sm:$0xf]  ;;  %v1426_v45 = vld [vmem:[#allocation8 + $0xe0] sm:$0xf]  ;;  %v1363_v48 = vor.u32 %v1710_v42, %v1362_v38  ;;  %s1990_s24 = smov [#allocation13]  }
  0x36   :  { %368 = vmatpush.bf16.msra.mxu2 %v1227_v6  ;;  %382 = vmatpush.bf16.msra.mxu3 %v1231_v10  ;;  %v1744_v40 = vld [vmem:[#allocation8 + $0x174] sm:$0xf0]  ;;  %v1726_v46 = vld [vmem:[#allocation8 + $0xe4] sm:$0xf0]  ;;  %v1354_v50 = vld [vmem:[#allocation8 + $0x50] sm:$0xf] }
  0x37   :  { %v1760_v44 = vld [vmem:[#allocation8 + $0x1f4] sm:$0xf0]  ;;  %v1499_v47 = vor.u32 %v1744_v40, %v1498_v39  ;;  %v1490_v51 = vld [vmem:[#allocation8 + $0x160] sm:$0xf]  ;;  %v1742_v52 = vld [vmem:[#allocation8 + $0x164] sm:$0xf0]  ;;  %v1427_v53 = vor.u32 %v1726_v46, %v1426_v45 }
  0x38   :  { %341 = vmatpush.bf16.msra.mxu0 %v1203_v16  ;;  %v1563_v49 = vor.u32 %v1760_v44, %v1562_v43  ;;  %v1708_v54 = vld [vmem:[#allocation8 + $0x54] sm:$0xf0]  ;;  %v1554_v55 = vld [vmem:[#allocation8 + $0x1e0] sm:$0xf]  ;;  %v1758_v56 = vld [vmem:[#allocation8 + $0x1e4] sm:$0xf0]  ;;  %v1491_v59 = vor.u32 %v1742_v52, %v1490_v51 }
  0x39   :  { %355 = vmatpush.bf16.msra.mxu1 %v1207_v18  ;;  %v1418_v57 = vld [vmem:[#allocation8 + $0xd0] sm:$0xf]  ;;  %v1724_v58 = vld [vmem:[#allocation8 + $0xd4] sm:$0xf0]  ;;  %v1355_v60 = vor.u32 %v1708_v54, %v1354_v50  ;;  %v1555_v61 = vor.u32 %v1758_v56, %v1554_v55  ;;  %v1346_v62 = vld [vmem:[#allocation8 + $0x40] sm:$0xf] }
  0x3a   :  { %369 = vmatpush.bf16.msra.mxu2 %v1211_v19  ;;  %383 = vmatpush.bf16.msra.mxu3 %v1215_v23  ;;  %v1482_v63 = vld [vmem:[#allocation8 + $0x150] sm:$0xf]  ;;  %v1740_v0 = vld [vmem:[#allocation8 + $0x154] sm:$0xf0]  ;;  %v1419_v1 = vor.u32 %v1724_v58, %v1418_v57  ;;  %v1706_v2 = vld [vmem:[#allocation8 + $0x44] sm:$0xf0] }
  0x3b   :  { %v1546_v3 = vld [vmem:[#allocation8 + $0x1d0] sm:$0xf]  ;;  %v1756_v4 = vld [vmem:[#allocation8 + $0x1d4] sm:$0xf0]  ;;  %v1410_v5 = vld [vmem:[#allocation8 + $0xc0] sm:$0xf]  ;;  %v1483_v7 = vor.u32 %v1740_v0, %v1482_v63  ;;  %v1347_v9 = vor.u32 %v1706_v2, %v1346_v62 }
  0x3c   :  { %342 = vmatpush.bf16.msra.mxu0 %v1187_v30  ;;  %v1722_v6 = vld [vmem:[#allocation8 + $0xc4] sm:$0xf0]  ;;  %v1338_v8 = vld [vmem:[#allocation8 + $0x30] sm:$0xf]  ;;  %v1547_v10 = vor.u32 %v1756_v4, %v1546_v3  ;;  %v1474_v11 = vld [vmem:[#allocation8 + $0x140] sm:$0xf] }
  0x3d   :  { %356 = vmatpush.bf16.msra.mxu1 %v1191_v33  ;;  %v1738_v12 = vld [vmem:[#allocation8 + $0x144] sm:$0xf0]  ;;  %v1411_v13 = vor.u32 %v1722_v6, %v1410_v5  ;;  %v1704_v14 = vld [vmem:[#allocation8 + $0x34] sm:$0xf0]  ;;  %v1538_v15 = vld [vmem:[#allocation8 + $0x1c0] sm:$0xf] }
  0x3e   :  { %370 = vmatpush.bf16.msra.mxu2 %v1195_v34  ;;  %384 = vmatpush.bf16.msra.mxu3 %v1199_v36  ;;  %v1754_v16 = vld [vmem:[#allocation8 + $0x1c4] sm:$0xf0]  ;;  %v1402_v17 = vld [vmem:[#allocation8 + $0xb0] sm:$0xf]  ;;  %v1720_v18 = vld [vmem:[#allocation8 + $0xb4] sm:$0xf0]  ;;  %v1475_v19 = vor.u32 %v1738_v12, %v1474_v11  ;;  %v1339_v20 = vor.u32 %v1704_v14, %v1338_v8 }
  0x3f   :  { %343 = vmatmul.bf16.vlgmr.msra.gmra.mxu0 %v1664_v35  ;;  %v1539_v21 = vor.u32 %v1754_v16, %v1538_v15  ;;  %v1330_v22 = vld [vmem:[#allocation8 + $0x20] sm:$0xf]  ;;  %v1466_v23 = vld [vmem:[#allocation8 + $0x130] sm:$0xf]  ;;  %v1736_v24 = vld [vmem:[#allocation8 + $0x134] sm:$0xf0]  ;;  %v1403_v25 = vor.u32 %v1720_v18, %v1402_v17 }
  0x40   :  { %793 = vmatpush.bf16.msrb.mxu0 %v1371_v37  ;;  %357 = vmatmul.bf16.vlgmr.msra.gmra.mxu1 %v1664_v35  ;;  %v1702_v26 = vld [vmem:[#allocation8 + $0x24] sm:$0xf0]  ;;  %v1530_v27 = vld [vmem:[#allocation8 + $0x1b0] sm:$0xf]  ;;  %v1752_v28 = vld [vmem:[#allocation8 + $0x1b4] sm:$0xf0]  ;;  %v1467_v31 = vor.u32 %v1736_v24, %v1466_v23 }
  0x41   :  { %807 = vmatpush.bf16.msrb.mxu1 %v1435_v41  ;;  %371 = vmatmul.bf16.vlgmr.msra.gmra.mxu2 %v1664_v35  ;;  %v1394_v29 = vld [vmem:[#allocation8 + $0xa0] sm:$0xf]  ;;  %v1718_v30 = vld [vmem:[#allocation8 + $0xa4] sm:$0xf0]  ;;  %v1331_v32 = vor.u32 %v1702_v26, %v1330_v22  ;;  %v1531_v33 = vor.u32 %v1752_v28, %v1530_v27  ;;  %v1322_v34 = vld [vmem:[#allocation8 + $0x10] sm:$0xf] }
  0x42   :  { %385 = vmatmul.bf16.vlgmr.msra.gmra.mxu3 %v1664_v35  ;;  %821 = vmatpush.bf16.msrb.mxu2 %v1499_v47  ;;  %v1458_v35 = vld [vmem:[#allocation8 + $0x120] sm:$0xf]  ;;  %v1734_v36 = vld [vmem:[#allocation8 + $0x124] sm:$0xf0]  ;;  %v1395_v37 = vor.u32 %v1718_v30, %v1394_v29  ;;  %v1700_v38 = vld [vmem:[#allocation8 + $0x14] sm:$0xf0] }
  0x43   :  { %835 = vmatpush.bf16.msrb.mxu3 %v1563_v49  ;;  %v1522_v39 = vld [vmem:[#allocation8 + $0x1a0] sm:$0xf]  ;;  %v1750_v40 = vld [vmem:[#allocation8 + $0x1a4] sm:$0xf0]  ;;  %v1386_v41 = vld [vmem:[#allocation8 + $0x90] sm:$0xf]  ;;  %v1459_v43 = vor.u32 %v1734_v36, %v1458_v35  ;;  %v1323_v44 = vor.u32 %v1700_v38, %v1322_v34 }
  0x44   :  { %794 = vmatpush.bf16.msrb.mxu0 %v1363_v48  ;;  %v1716_v42 = vld [vmem:[#allocation8 + $0x94] sm:$0xf0]  ;;  %v1523_v45 = vor.u32 %v1750_v40, %v1522_v39  ;;  %v1314_v47 = vld [vmem:[#allocation8] sm:$0xf]  ;;  %v1698_v48 = vld [vmem:[#allocation8 + $0x4] sm:$0xf0] }
  0x45   :  { %808 = vmatpush.bf16.msrb.mxu1 %v1427_v53  ;;  %v1387_v46 = vor.u32 %v1716_v42, %v1386_v41  ;;  %v1378_v49 = vld [vmem:[#allocation8 + $0x80] sm:$0xf]  ;;  %v1714_v50 = vld [vmem:[#allocation8 + $0x84] sm:$0xf0]  ;;  %v1315_v51 = vor.u32 %v1698_v48, %v1314_v47  ;;  %v1711_v53 = vld [vmem:[#allocation8 + $0x74] sm:$0xf] }
  0x46   :  { %822 = vmatpush.bf16.msrb.mxu2 %v1491_v59  ;;  %v1379_v52 = vor.u32 %v1714_v50, %v1378_v49  ;;  %v1372_v54 = vld [vmem:[#allocation8 + $0x78] sm:$0xf0]  ;;  %v1727_v55 = vld [vmem:[#allocation8 + $0xf4] sm:$0xf]  ;;  %v1450_v58 = vld [vmem:[#allocation8 + $0x110] sm:$0xf] }
  0x47   :  { %836 = vmatpush.bf16.msrb.mxu3 %v1555_v61  ;;  %v1375_v56 = vor.u32 %v1711_v53, %v1372_v54  ;;  %v1436_v57 = vld [vmem:[#allocation8 + $0xf8] sm:$0xf0]  ;;  %v1732_v59 = vld [vmem:[#allocation8 + $0x114] sm:$0xf0]  ;;  %v1514_v62 = vld [vmem:[#allocation8 + $0x190] sm:$0xf] }
  0x48   :  { %795 = vmatpush.bf16.msrb.mxu0 %v1355_v60  ;;  %v1439_v60 = vor.u32 %v1727_v55, %v1436_v57  ;;  %v1451_v61 = vor.u32 %v1732_v59, %v1450_v58  ;;  %v1748_v63 = vld [vmem:[#allocation8 + $0x194] sm:$0xf0]  ;;  %v1364_v2 = vld [vmem:[#allocation8 + $0x68] sm:$0xf0]  ;;  %v1725_v4 = vld [vmem:[#allocation8 + $0xe4] sm:$0xf] }
  0x49   :  { %809 = vmatpush.bf16.msrb.mxu1 %v1419_v1  ;;  %v1515_v0 = vor.u32 %v1748_v63, %v1514_v62  ;;  %v1709_v1 = vld [vmem:[#allocation8 + $0x64] sm:$0xf]  ;;  %v1428_v5 = vld [vmem:[#allocation8 + $0xe8] sm:$0xf0]  ;;  %v1442_v6 = vld [vmem:[#allocation8 + $0x100] sm:$0xf] }
  0x4a   :  { %823 = vmatpush.bf16.msrb.mxu2 %v1483_v7  ;;  %v1367_v3 = vor.u32 %v1709_v1, %v1364_v2  ;;  %v1431_v7 = vor.u32 %v1725_v4, %v1428_v5  ;;  %v1730_v8 = vld [vmem:[#allocation8 + $0x104] sm:$0xf0]  ;;  %v1500_v14 = vld [vmem:[#allocation8 + $0x178] sm:$0xf0]  ;;  %v1759_v16 = vld [vmem:[#allocation8 + $0x1f4] sm:$0xf] }
  0x4b   :  { %837 = vmatpush.bf16.msrb.mxu3 %v1547_v10  ;;  %v1746_v10 = vld [vmem:[#allocation8 + $0x184] sm:$0xf0]  ;;  %v1443_v11 = vor.u32 %v1730_v8, %v1442_v6  ;;  %v1564_v17 = vld [vmem:[#allocation8 + $0x1f8] sm:$0xf0]  ;;  %v1707_v18 = vld [vmem:[#allocation8 + $0x54] sm:$0xf] }
  0x4c   :  { %796 = vmatpush.bf16.msrb.mxu0 %v1347_v9  ;;  %v1506_v9 = vld [vmem:[#allocation8 + $0x180] sm:$0xf]  ;;  %v1420_v22 = vld [vmem:[#allocation8 + $0xd8] sm:$0xf0]  ;;  %v1492_v26 = vld [vmem:[#allocation8 + $0x168] sm:$0xf0] }
  0x4d   :  { %810 = vmatpush.bf16.msrb.mxu1 %v1411_v13  ;;  %v1507_v12 = vor.u32 %v1746_v10, %v1506_v9  ;;  %v1743_v13 = vld [vmem:[#allocation8 + $0x174] sm:$0xf]  ;;  %v1757_v28 = vld [vmem:[#allocation8 + $0x1e4] sm:$0xf]  ;;  %v1556_v29 = vld [vmem:[#allocation8 + $0x1e8] sm:$0xf0] }
  0x4e   :  { %824 = vmatpush.bf16.msrb.mxu2 %v1475_v19  ;;  %v1503_v15 = vor.u32 %v1743_v13, %v1500_v14  ;;  %v1567_v19 = vor.u32 %v1759_v16, %v1564_v17  ;;  %v1559_v30 = vor.u32 %v1757_v28, %v1556_v29  ;;  %v1412_v35 = vld [vmem:[#allocation8 + $0xc8] sm:$0xf0]  ;;  %v1484_v38 = vld [vmem:[#allocation8 + $0x158] sm:$0xf0]  ;;  %v1755_v39 = vld [vmem:[#allocation8 + $0x1d4] sm:$0xf] }
  0x4f   :  { %838 = vmatpush.bf16.msrb.mxu3 %v1539_v21  ;;  %v1723_v21 = vld [vmem:[#allocation8 + $0xd4] sm:$0xf]  ;;  %v1548_v41 = vld [vmem:[#allocation8 + $0x1d8] sm:$0xf0]  ;;  %v1737_v49 = vld [vmem:[#allocation8 + $0x144] sm:$0xf] }
  0x50   :  { %797 = vmatpush.bf16.msrb.mxu0 %v1339_v20  ;;  %v1356_v20 = vld [vmem:[#allocation8 + $0x58] sm:$0xf0]  ;;  %v1423_v24 = vor.u32 %v1723_v21, %v1420_v22  ;;  %v1551_v42 = vor.u32 %v1755_v39, %v1548_v41  ;;  %v1476_v50 = vld [vmem:[#allocation8 + $0x148] sm:$0xf0]  ;;  %v1701_v55 = vld [vmem:[#allocation8 + $0x24] sm:$0xf] }
  0x51   :  { %811 = vmatpush.bf16.msrb.mxu1 %v1403_v25  ;;  %v1359_v23 = vor.u32 %v1707_v18, %v1356_v20  ;;  %v1741_v25 = vld [vmem:[#allocation8 + $0x164] sm:$0xf]  ;;  %v1404_v47 = vld [vmem:[#allocation8 + $0xb8] sm:$0xf0]  ;;  %v1540_v53 = vld [vmem:[#allocation8 + $0x1c8] sm:$0xf0] }
  0x52   :  { %825 = vmatpush.bf16.msrb.mxu2 %v1467_v31  ;;  %v1495_v27 = vor.u32 %v1741_v25, %v1492_v26  ;;  %v1705_v31 = vld [vmem:[#allocation8 + $0x44] sm:$0xf]  ;;  %v1396_v59 = vld [vmem:[#allocation8 + $0xa8] sm:$0xf0]  ;;  %v1468_v62 = vld [vmem:[#allocation8 + $0x138] sm:$0xf0] }
  0x53   :  { %839 = vmatpush.bf16.msrb.mxu3 %v1531_v33  ;;  %v1721_v33 = vld [vmem:[#allocation8 + $0xc4] sm:$0xf]  ;;  %v1751_v63 = vld [vmem:[#allocation8 + $0x1b4] sm:$0xf]  ;;  %v1532_v1 = vld [vmem:[#allocation8 + $0x1b8] sm:$0xf0] }
  0x54   :  { %798 = vmatpush.bf16.msrb.mxu0 %v1331_v32  ;;  %v1348_v32 = vld [vmem:[#allocation8 + $0x48] sm:$0xf0]  ;;  %v1415_v36 = vor.u32 %v1721_v33, %v1412_v35  ;;  %v1717_v57 = vld [vmem:[#allocation8 + $0xa4] sm:$0xf]  ;;  %v1535_v2 = vor.u32 %v1751_v63, %v1532_v1  ;;  %v1324_v4 = vld [vmem:[#allocation8 + $0x18] sm:$0xf0] }
  0x55   :  { %812 = vmatpush.bf16.msrb.mxu1 %v1395_v37  ;;  %v1351_v34 = vor.u32 %v1705_v31, %v1348_v32  ;;  %v1739_v37 = vld [vmem:[#allocation8 + $0x154] sm:$0xf]  ;;  %v1733_v8 = vld [vmem:[#allocation8 + $0x124] sm:$0xf]  ;;  %v1460_v9 = vld [vmem:[#allocation8 + $0x128] sm:$0xf0] }
  0x56   :  { %826 = vmatpush.bf16.msrb.mxu2 %v1459_v43  ;;  %v1487_v40 = vor.u32 %v1739_v37, %v1484_v38  ;;  %v1703_v43 = vld [vmem:[#allocation8 + $0x34] sm:$0xf]  ;;  %v1524_v13 = vld [vmem:[#allocation8 + $0x1a8] sm:$0xf0]  ;;  %v1697_v14 = vld [vmem:[#allocation8 + $0x4] sm:$0xf] }
  0x57   :  { %840 = vmatpush.bf16.msrb.mxu3 %v1523_v45  ;;  %v1719_v45 = vld [vmem:[#allocation8 + $0xb4] sm:$0xf]  ;;  %v1316_v16 = vld [vmem:[#allocation8 + $0x8] sm:$0xf0]  ;;  %v1713_v17 = vld [vmem:[#allocation8 + $0x84] sm:$0xf] }
  0x58   :  { %799 = vmatpush.bf16.msrb.mxu0 %v1323_v44  ;;  %v1340_v44 = vld [vmem:[#allocation8 + $0x38] sm:$0xf0]  ;;  %v1407_v48 = vor.u32 %v1719_v45, %v1404_v47  ;;  %v1715_v5 = vld [vmem:[#allocation8 + $0x94] sm:$0xf]  ;;  %v1380_v18 = vld [vmem:[#allocation8 + $0x88] sm:$0xf0] }
  0x59   :  { %813 = vmatpush.bf16.msrb.mxu1 %v1387_v46  ;;  %v1343_v46 = vor.u32 %v1703_v43, %v1340_v44  ;;  %v1383_v20 = vor.u32 %v1713_v17, %v1380_v18  ;;  %v1731_v21 = vld [vmem:[#allocation8 + $0x114] sm:$0xf]  ;;  %v1452_v22 = vld [vmem:[#allocation8 + $0x118] sm:$0xf0]  ;;  %v1729_v29 = vld [vmem:[#allocation8 + $0x104] sm:$0xf] }
  0x5a   :  { %827 = vmatpush.bf16.msrb.mxu2 %v1451_v61  ;;  %v1735_v61 = vld [vmem:[#allocation8 + $0x134] sm:$0xf]  ;;  %v1455_v25 = vor.u32 %v1731_v21, %v1452_v22  ;;  %v1745_v31 = vld [vmem:[#allocation8 + $0x184] sm:$0xf]  ;;  %v1508_v35 = vld [vmem:[#allocation8 + $0x188] sm:$0xf0] }
  0x5b   :  { %841 = vmatpush.bf16.msrb.mxu3 %v1515_v0  ;;  %v1471_v0 = vor.u32 %v1735_v61, %v1468_v62  ;;  %v1511_v37 = vor.u32 %v1745_v31, %v1508_v35  ;;  %v467_v17 = vld [vmem:[%s2081_s4] sm:$0x3]  ;;  %v1769_v22 = vld [vmem:[#allocation10 + $0x40] sm:$0xff]  ;;  %s1162_s25 = sshll.u32 %s1990_s24, 4  ;;  %s1164_s26 = sshll.u32 %s2086_s9, 4  ;;  %s1163_s25 = int_to_ptr.vmem [resolvable:$true] %s1162_s25  ;;  %s1165_s26 = int_to_ptr.hbm [resolvable:$true] %s1164_s26 }
  0x5c   :  { %800 = vmatpush.bf16.msrb.mxu0 %v1315_v51  ;;  %v1753_v51 = vld [vmem:[#allocation8 + $0x1c4] sm:$0xf] }
  0x5d   :  { %814 = vmatpush.bf16.msrb.mxu1 %v1379_v52  ;;  %v1479_v52 = vor.u32 %v1737_v49, %v1476_v50  ;;  %v1543_v54 = vor.u32 %v1753_v51, %v1540_v53 }
  0x5e   :  { %828 = vmatpush.bf16.msrb.mxu2 %v1443_v11  ;;  %v1463_v11 = vor.u32 %v1733_v8, %v1460_v9  ;;  %v1763_v8 = vld [vmem:[#allocation10 + $0x10] sm:$0xff] }
  0x5f   :  { %842 = vmatpush.bf16.msrb.mxu3 %v1507_v12  ;;  %v1749_v12 = vld [vmem:[#allocation8 + $0x1a4] sm:$0xf]  ;;  %v1775_v9 = vld [vmem:[#allocation10 + $0x70] sm:$0xff] }
  0x60   :  { %849 = vmatpush.bf16.msra.mxu0 %v1375_v56  ;;  %v1332_v56 = vld [vmem:[#allocation8 + $0x28] sm:$0xf0] }
  0x61   :  { %863 = vmatpush.bf16.msra.mxu1 %v1439_v60  ;;  %v1335_v58 = vor.u32 %v1701_v55, %v1332_v56  ;;  %v1399_v60 = vor.u32 %v1717_v57, %v1396_v59 }
  0x62   :  { %877 = vmatpush.bf16.msra.mxu2 %v1503_v15  ;;  %v1527_v15 = vor.u32 %v1749_v12, %v1524_v13  ;;  %v1761_v12 = vld [vmem:[#allocation10] sm:$0xff] }
  0x63   :  { %891 = vmatpush.bf16.msra.mxu3 %v1567_v19  ;;  %v1319_v19 = vor.u32 %v1697_v14, %v1316_v16  ;;  %v1773_v13 = vld [vmem:[#allocation10 + $0x60] sm:$0xff]  ;;  %v1772_v14 = vld [vmem:[#allocation10 + $0x58] sm:$0xff]  ;;  %v1771_v16 = vld [vmem:[#allocation10 + $0x50] sm:$0xff] }
  0x64   :  { %850 = vmatpush.bf16.msra.mxu0 %v1367_v3  ;;  %v1699_v3 = vld [vmem:[#allocation8 + $0x14] sm:$0xf] }
  0x65   :  { %864 = vmatpush.bf16.msra.mxu1 %v1431_v7  ;;  %v1327_v6 = vor.u32 %v1699_v3, %v1324_v4  ;;  %v1388_v7 = vld [vmem:[#allocation8 + $0x98] sm:$0xf0]  ;;  %v1767_v3 = vld [vmem:[#allocation10 + $0x30] sm:$0xff]  ;;  %v1766_v4 = vld [vmem:[#allocation10 + $0x28] sm:$0xff] }
  0x66   :  { %878 = vmatpush.bf16.msra.mxu2 %v1495_v27  ;;  %v1391_v10 = vor.u32 %v1715_v5, %v1388_v7  ;;  %v159_v27 = vld [vmem:[#allocation7] sm:$0xf]  ;;  %v1765_v5 = vld [vmem:[#allocation10 + $0x20] sm:$0xff] }
  0x67   :  { %892 = vmatpush.bf16.msra.mxu3 %v1559_v30  ;;  %v1444_v30 = vld [vmem:[#allocation8 + $0x108] sm:$0xf0]  ;;  %v161_v32 = vperm.slane %v159_v27, 0  ;;  %v163_v47 = vperm.slane %v159_v27, 2  ;;  %v164_v49 = vperm.slane %v159_v27, 3  ;;  %v1776_v7 = vld [vmem:[#allocation10 + $0x78] sm:$0xff] }
  0x68   :  { %851 = vmatpush.bf16.msra.mxu0 %v1359_v23  ;;  %v1747_v23 = vld [vmem:[#allocation8 + $0x194] sm:$0xf] }
  0x69   :  { %865 = vmatpush.bf16.msra.mxu1 %v1423_v24  ;;  %v1516_v24 = vld [vmem:[#allocation8 + $0x198] sm:$0xf0] }
  0x6a   :  { %879 = vmatpush.bf16.msra.mxu2 %v1487_v40  ;;  %v1519_v26 = vor.u32 %v1747_v23, %v1516_v24 }
  0x6b   :  { %893 = vmatpush.bf16.msra.mxu3 %v1551_v42 }
  0x6c   :  { %852 = vmatpush.bf16.msra.mxu0 %v1351_v34  ;;  %v1447_v34 = vor.u32 %v1729_v29, %v1444_v30 }
  0x6d   :  { %866 = vmatpush.bf16.msra.mxu1 %v1415_v36  ;;  %v162_v36 = vperm.slane %v159_v27, 1 }
  0x6e   :  { %880 = vmatpush.bf16.msra.mxu2 %v1479_v52  ;;  %v1768_v52 = vld [vmem:[#allocation10 + $0x38] sm:$0xff] }
  0x6f   :  { %894 = vmatpush.bf16.msra.mxu3 %v1543_v54 }
  0x70   :  { %853 = vmatpush.bf16.msra.mxu0 %v1343_v46 }
  0x71   :  { %867 = vmatpush.bf16.msra.mxu1 %v1407_v48 }
  0x72   :  { %881 = vmatpush.bf16.msra.mxu2 %v1471_v0 }
  0x73   :  { %895 = vmatpush.bf16.msra.mxu3 %v1535_v2 }
  0x74   :  { %854 = vmatpush.bf16.msra.mxu0 %v1335_v58 }
  0x75   :  { %868 = vmatpush.bf16.msra.mxu1 %v1399_v60 }
  0x76   :  { %882 = vmatpush.bf16.msra.mxu2 %v1463_v11  ;;  %v1774_v11 = vld [vmem:[#allocation10 + $0x68] sm:$0xff] }
  0x77   :  { %896 = vmatpush.bf16.msra.mxu3 %v1527_v15 }
  0x78   :  { %855 = vmatpush.bf16.msra.mxu0 %v1327_v6  ;;  %v1764_v6 = vld [vmem:[#allocation10 + $0x18] sm:$0xff] }
  0x79   :  { %869 = vmatpush.bf16.msra.mxu1 %v1391_v10  ;;  %v1762_v10 = vld [vmem:[#allocation10 + $0x8] sm:$0xff] }
  0x7a   :  { %883 = vmatpush.bf16.msra.mxu2 %v1455_v25 }
  0x7b   :  { %897 = vmatpush.bf16.msra.mxu3 %v1519_v26 }
  0x7c   :  { %856 = vmatpush.bf16.msra.mxu0 %v1319_v19  ;;  %v1770_v19 = vld [vmem:[#allocation10 + $0x48] sm:$0xff] }
  0x7d   :  { %870 = vmatpush.bf16.msra.mxu1 %v1383_v20  ;;  %v469_v20 = vperm.slane %v467_v17, 0 }
  0x7e   :  { %884 = vmatpush.bf16.msra.mxu2 %v1447_v34 }
  0x7f   :  { %898 = vmatpush.bf16.msra.mxu3 %v1511_v37 }
  0xbc   :  { %v344_v28 = vpop.f32.mrf.mxu0 }
  0xbd   :  { %v358_v33 = vpop.f32.mrf.mxu1  ;;  %v345_v38 = vadd.f32 %v344_v28, %v161_v32 }
  0xbe   :  { %v359_v39 = vadd.f32 %v358_v33, %v162_v36 }
  0xbf   :  { %v391_v43 = vmax.f32 %v345_v38, 0.0 }
  0xc0   :  { %v392_v46 = vmax.f32 %v359_v39, 0.0 }
  0xc4   :  { %v372_v40 = vpop.f32.mrf.mxu2  ;;  %v346_v42 = vpop.f32.mrf.mxu0 }
  0xc5   :  { %v386_v41 = vpop.f32.mrf.mxu3  ;;  %v347_v44 = vadd.f32 %v346_v42, %v161_v32  ;;  %v360_v45 = vpop.f32.mrf.mxu1  ;;  %v373_v54 = vadd.f32 %v372_v40, %v163_v47 }
  0xc6   :  { %v361_v48 = vadd.f32 %v360_v45, %v162_v36  ;;  %v387_v56 = vadd.f32 %v386_v41, %v164_v49  ;;  %v470_v36 = vperm.slane %v467_v17, 1 }
  0xc7   :  { %v395_v50 = vmax.f32 %v347_v44, 0.0  ;;  %v393_v61 = vmax.f32 %v373_v54, 0.0 }
  0xc8   :  { %v396_v51 = vmax.f32 %v361_v48, 0.0  ;;  %v394_v63 = vmax.f32 %v387_v56, 0.0 }
  0xc9   :  { %v399_v53 = vpack.c.bf16 %v395_v50, %v391_v43 }
  0xca   :  { %v400_v55 = vpack.c.bf16 %v396_v51, %v392_v46 }
  0xcb   :  { %801 = vmatmul.bf16.vlgmr.msrb.gmra.mxu0 %v399_v53 }
  0xcc   :  { %v374_v57 = vpop.f32.mrf.mxu2  ;;  %815 = vmatmul.bf16.vlgmr.msrb.gmra.mxu1 %v400_v55  ;;  %1043 = vmatpush.bf16.msrb.mxu0 %v1768_v52 }
  0xcd   :  { %v375_v58 = vadd.f32 %v374_v57, %v163_v47  ;;  %v388_v59 = vpop.f32.mrf.mxu3  ;;  %1057 = vmatpush.bf16.msrb.mxu1 %v1776_v7 }
  0xce   :  { %v389_v60 = vadd.f32 %v388_v59, %v164_v49  ;;  %v1784_v59 = vld [vmem:[#allocation11 + $0x38] sm:$0xff] }
  0xcf   :  { %v397_v62 = vmax.f32 %v375_v58, 0.0 }
  0xd0   :  { %v398_v0 = vmax.f32 %v389_v60, 0.0  ;;  %1044 = vmatpush.bf16.msrb.mxu0 %v1767_v3  ;;  %v1783_v60 = vld [vmem:[#allocation11 + $0x30] sm:$0xff] }
  0xd1   :  { %v401_v1 = vpack.c.bf16 %v397_v62, %v393_v61  ;;  %1058 = vmatpush.bf16.msrb.mxu1 %v1775_v9  ;;  %v1782_v61 = vld [vmem:[#allocation11 + $0x28] sm:$0xff]  ;;  %v1781_v62 = vld [vmem:[#allocation11 + $0x20] sm:$0xff] }
  0xd2   :  { %v402_v2 = vpack.c.bf16 %v398_v0, %v394_v63  ;;  %v1780_v63 = vld [vmem:[#allocation11 + $0x18] sm:$0xff]  ;;  %v1779_v0 = vld [vmem:[#allocation11 + $0x10] sm:$0xff] }
  0xd3   :  { %829 = vmatmul.bf16.vlgmr.msrb.gmra.mxu2 %v401_v1 }
  0xd4   :  { %843 = vmatmul.bf16.vlgmr.msrb.gmra.mxu3 %v402_v2  ;;  %1045 = vmatpush.bf16.msrb.mxu0 %v1766_v4 }
  0xd5   :  { %1059 = vmatpush.bf16.msrb.mxu1 %v1774_v11  ;;  %1142 = vmatpush.bf16.msrb.mxu2 %v1784_v59 }
  0xd8   :  { %1046 = vmatpush.bf16.msrb.mxu0 %v1765_v5  ;;  %v1798_v5 = vld [vmem:[%s2083_s6] ss:$0 sm:$0xff] }
  0xd9   :  { %1060 = vmatpush.bf16.msrb.mxu1 %v1773_v13  ;;  %1143 = vmatpush.bf16.msrb.mxu2 %v1783_v60 }
  0xdb   :  { %857 = vmatmul.bf16.vlgmr.msra.gmra.mxu0 %v399_v53 }
  0xdc   :  { %871 = vmatmul.bf16.vlgmr.msra.gmra.mxu1 %v400_v55  ;;  %1047 = vmatpush.bf16.msrb.mxu0 %v1764_v6 }
  0xdd   :  { %1061 = vmatpush.bf16.msrb.mxu1 %v1772_v14  ;;  %1144 = vmatpush.bf16.msrb.mxu2 %v1782_v61 }
  0xe0   :  { %1048 = vmatpush.bf16.msrb.mxu0 %v1763_v8 }
  0xe1   :  { %1062 = vmatpush.bf16.msrb.mxu1 %v1771_v16  ;;  %1145 = vmatpush.bf16.msrb.mxu2 %v1781_v62 }
  0xe3   :  { %885 = vmatmul.bf16.vlgmr.msra.gmra.mxu2 %v401_v1  ;;  %v1778_v1 = vld [vmem:[#allocation11 + $0x8] sm:$0xff] }
  0xe4   :  { %899 = vmatmul.bf16.vlgmr.msra.gmra.mxu3 %v402_v2  ;;  %1049 = vmatpush.bf16.msrb.mxu0 %v1762_v10  ;;  %v1777_v2 = vld [vmem:[#allocation11] sm:$0xff] }
  0xe5   :  { %1063 = vmatpush.bf16.msrb.mxu1 %v1770_v19  ;;  %1146 = vmatpush.bf16.msrb.mxu2 %v1780_v63 }
  0xe8   :  { %1050 = vmatpush.bf16.msrb.mxu0 %v1761_v12 }
  0xe9   :  { %1064 = vmatpush.bf16.msrb.mxu1 %v1769_v22  ;;  %1147 = vmatpush.bf16.msrb.mxu2 %v1779_v0 }
  0xed   :  { %1148 = vmatpush.bf16.msrb.mxu2 %v1778_v1 }
  0xf1   :  { %1149 = vmatpush.bf16.msrb.mxu2 %v1777_v2 }
 0x148   :  { %v802_v15 = vpop.f32.mrf.mxu0 }
 0x149   :  { %v816_v18 = vpop.f32.mrf.mxu1  ;;  %v803_v23 = vadd.f32 %v802_v15, %v469_v20  ;;  %v1799_v15 = vld [vmem:[%s2085_s8] ss:$0 sm:$0xff] }
 0x14b   :  { %v817_v27 = vadd.f32 %v816_v18, %v803_v23 }
 0x150   :  { %v804_v21 = vpop.f32.mrf.mxu0 }
 0x151   :  { %v818_v26 = vpop.f32.mrf.mxu1  ;;  %v805_v28 = vadd.f32 %v804_v21, %v469_v20 }
 0x153   :  { %v819_v31 = vadd.f32 %v818_v26, %v805_v28 }
 0x156   :  { %v830_v24 = vpop.f32.mrf.mxu2 }
 0x157   :  { %v844_v25 = vpop.f32.mrf.mxu3  ;;  %v831_v29 = vadd.f32 %v830_v24, %v817_v27 }
 0x158   :  { %v858_v30 = vpop.f32.mrf.mxu0 }
 0x159   :  { %v845_v33 = vadd.f32 %v844_v25, %v831_v29  ;;  %v872_v38 = vpop.f32.mrf.mxu1  ;;  %v859_v41 = vadd.f32 %v858_v30, %v470_v36 }
 0x15b   :  { %v905_v39 = vmax.f32 %v845_v33, 0.0  ;;  %v873_v46 = vadd.f32 %v872_v38, %v859_v41 }
 0x15e   :  { %v832_v32 = vpop.f32.mrf.mxu2 }
 0x15f   :  { %v833_v34 = vadd.f32 %v832_v32, %v819_v31  ;;  %v846_v35 = vpop.f32.mrf.mxu3 }
 0x160   :  { %v860_v43 = vpop.f32.mrf.mxu0 }
 0x161   :  { %v847_v37 = vadd.f32 %v846_v35, %v833_v34  ;;  %v861_v47 = vadd.f32 %v860_v43, %v470_v36  ;;  %v874_v49 = vpop.f32.mrf.mxu1 }
 0x163   :  { %v907_v40 = vmax.f32 %v847_v37, 0.0  ;;  %v875_v50 = vadd.f32 %v874_v49, %v861_v47 }
 0x165   :  { %v909_v42 = vpack.c.bf16 %v907_v40, %v905_v39 }
 0x166   :  { %v886_v44 = vpop.f32.mrf.mxu2 }
 0x167   :  { %v900_v45 = vpop.f32.mrf.mxu3  ;;  %1051 = vmatmul.bf16.vlgmr.msrb.gmra.mxu0 %v909_v42  ;;  %v887_v48 = vadd.f32 %v886_v44, %v873_v46 }
 0x169   :  { %v901_v52 = vadd.f32 %v900_v45, %v887_v48 }
 0x16b   :  { %v906_v56 = vmax.f32 %v901_v52, 0.0 }
 0x16e   :  { %v888_v51 = vpop.f32.mrf.mxu2 }
 0x16f   :  { %v889_v53 = vadd.f32 %v888_v51, %v875_v50  ;;  %v902_v54 = vpop.f32.mrf.mxu3 }
 0x171   :  { %v903_v55 = vadd.f32 %v902_v54, %v889_v53 }
 0x173   :  { %v908_v57 = vmax.f32 %v903_v55, 0.0 }
 0x175   :  { %v910_v58 = vpack.c.bf16 %v908_v57, %v906_v56 }
 0x177   :  { %1065 = vmatmul.bf16.vlgmr.msrb.gmra.mxu1 %v910_v58 }
 0x1e4   :  { %v1052_v3 = vpop.f32.mrf.mxu0 }
 0x1e5   :  { %v1053_v7 = vadd.f32 %v1798_v5, %v1052_v3 }
 0x1ec   :  { %v1054_v6 = vpop.f32.mrf.mxu0 }
 0x1ed   :  { %v1055_v8 = vadd.f32 %v1798_v5, %v1054_v6 }
 0x1f4   :  { %v1066_v4 = vpop.f32.mrf.mxu1 }
 0x1f5   :  { %v1067_v9 = vadd.f32 %v1066_v4, %v1053_v7 }
 0x1f7   :  { %v1071_v12 = vmax.f32 %v1067_v9, 0.0 }
 0x1fc   :  { %v1068_v10 = vpop.f32.mrf.mxu1 }
 0x1fd   :  { %v1069_v11 = vadd.f32 %v1068_v10, %v1055_v8 }
 0x1ff   :  { %v1072_v13 = vmax.f32 %v1069_v11, 0.0 }
 0x201   :  { %v1073_v14 = vpack.c.bf16 %v1072_v13, %v1071_v12 }
 0x203   :  { %1150 = vmatmul.bf16.vlgmr.msrb.gmra.mxu2 %v1073_v14 }
 0x286   :  { %v1151_v16 = vpop.f32.mrf.mxu2 }
 0x287   :  { %v1152_v17 = vadd.f32 %v1799_v15, %v1151_v16 }
 0x289   :  { %1156 = vst [vmem:[#allocation13] sm:$0xff] %v1152_v17 }
 0x28e   :  { %v1153_v18 = vpop.f32.mrf.mxu2 }
 0x28f   :  { %v1154_v19 = vadd.f32 %v1799_v15, %v1153_v18 }
 0x291   :  { %1157 = vst [vmem:[#allocation13 + $0x8] sm:$0xff] %v1154_v19 }
 0x292   :  { %1170 = dma.vmem_to_hbm [thread:$0]  %s1163_s25, 256, %s1165_s26, [#allocation4], %s1982_s21, %s1982_s21, %s1983_s22  }
 0x293   :  { %1976 = dma.done.wait [#allocation4], 256  }
 0x294   :  { %1977 = vsyncadd [#allocation4], 4294967040 }
 0x295   :  { %1175 = vsyncpa [#allocation3], 1 }
 0x296   :  { %1176 = vsyncpa [#allocation6], 1 }
 0x297   :  { %1177 = vsyncpa [#allocation9], 1 }
 0x298   :  { %1178 = vsyncpa [#allocation12], 1 }
 0x299   :  { %1179 = vsyncpa [#allocation4], 1 }

</bundles_post_ra>
